<compile_context>
chip_gen: v5e
topology: v5e:2x2
jax: 0.10.0
libtpu: 0.0.40
codegen_flags: <defaults>
</compile_context>

<pallas_src>
import functools

import jax
import jax.numpy as jnp
import numpy as np
from jax import lax
from jax.experimental import pallas as pl
from jax.experimental.pallas import tpu as pltpu


def _smooth_l1(d):
    a = jnp.abs(d)
    return jnp.where(a < 1.0, 0.5 * d * d, a - 0.5)


def _multibox_loss_kernel(loc_ref, conf_ref, priors_ref, tgt_ref, out_ref,
                          *, threshold, var0, var1, negpos_ratio):
    # Block views (P on lanes):
    #   loc_ref    (1, 4, P)   rows = predicted [g_cx, g_cy, g_w, g_h]
    #   conf_ref   (1, C, P)   rows = class logits
    #   priors_ref (4, P)      rows = [cx, cy, w, h]
    #   tgt_ref    (1, O, 5)   per object [xmin, ymin, xmax, ymax, label]
    #   out_ref    (1, 1, 128) lanes [0..2] = [loss_l_sum, loss_c_sum, num_pos]
    loc = loc_ref[0]            # (4, P)
    conf = conf_ref[0]          # (C, P)
    priors = priors_ref[...]    # (4, P)
    tgt = tgt_ref[0]            # (O, 5)

    P = loc.shape[1]
    C = conf.shape[0]
    O = tgt.shape[0]
    f32 = jnp.float32

    cx, cy = priors[0:1, :], priors[1:2, :]               # (1, P)
    pw, ph = priors[2:3, :], priors[3:4, :]
    p_xmin = cx - 0.5 * pw
    p_ymin = cy - 0.5 * ph
    p_xmax = cx + 0.5 * pw
    p_ymax = cy + 0.5 * ph

    t_xmin = tgt[:, 0:1]                                   # (O, 1)
    t_ymin = tgt[:, 1:2]
    t_xmax = tgt[:, 2:3]
    t_ymax = tgt[:, 3:4]
    t_lab = tgt[:, 4:5]

    # ---- jaccard overlaps (O, P) -------------------------------------------
    iw = jnp.maximum(jnp.minimum(t_xmax, p_xmax) - jnp.maximum(t_xmin, p_xmin), 0.0)
    ih = jnp.maximum(jnp.minimum(t_ymax, p_ymax) - jnp.maximum(t_ymin, p_ymin), 0.0)
    inter = iw * ih
    area_t = (t_xmax - t_xmin) * (t_ymax - t_ymin)         # (O, 1)
    area_p = (p_xmax - p_xmin) * (p_ymax - p_ymin)         # (1, P)
    overlaps = inter / (area_t + area_p - inter)           # (O, P)  exact (matching is threshold-sensitive)

    prior_if = lax.broadcasted_iota(jnp.int32, (O, P), 1).astype(f32)
    truth_jf = lax.broadcasted_iota(jnp.int32, (O, P), 0).astype(f32)

    # best prior per truth (argmax over lanes; ties -> lowest prior index)
    bp_ov = jnp.max(overlaps, axis=1, keepdims=True)                                   # (O, 1)
    bp_idx = jnp.min(jnp.where(overlaps == bp_ov, prior_if, float(P)),
                     axis=1, keepdims=True)                                            # (O, 1)

    # best truth per prior (argmax over sublanes; ties -> lowest truth index)
    bt_ov = jnp.max(overlaps, axis=0, keepdims=True)                                   # (1, P)
    bt_idx = jnp.min(jnp.where(overlaps == bt_ov, truth_jf, float(O)),
                     axis=0, keepdims=True)                                            # (1, P)

    # force-match: each truth's best prior takes that truth (later j wins), overlap := 2
    eq = bp_idx == prior_if                                                            # (O, P)
    forced = jnp.max(jnp.where(eq, 1.0, 0.0), axis=0, keepdims=True) > 0.5             # (1, P)
    forced_j = jnp.max(jnp.where(eq, truth_jf, -1.0), axis=0, keepdims=True)           # (1, P)
    bt_idx = jnp.where(forced, forced_j, bt_idx)
    bt_ov = jnp.where(forced, 2.0, bt_ov)

    # gather matched truth boxes / labels (one-hot over O sublanes; O is tiny)
    onehot = (truth_jf == bt_idx).astype(f32)                                          # (O, P)
    m_xmin = jnp.sum(onehot * t_xmin, axis=0, keepdims=True)                           # (1, P)
    m_ymin = jnp.sum(onehot * t_ymin, axis=0, keepdims=True)
    m_xmax = jnp.sum(onehot * t_xmax, axis=0, keepdims=True)
    m_ymax = jnp.sum(onehot * t_ymax, axis=0, keepdims=True)
    g_lab = jnp.sum(onehot * t_lab, axis=0, keepdims=True)                             # (1, P)

    conf_cls = jnp.where(bt_ov < threshold, 0.0, g_lab + 1.0)                          # (1, P)
    pos = conf_cls > 0.5                                                               # (1, P)

    # ---- encode matched boxes against priors + smooth-L1 --------------------
    g_cx = ((m_xmin + m_xmax) * 0.5 - cx) / (var0 * pw)
    g_cy = ((m_ymin + m_ymax) * 0.5 - cy) / (var0 * ph)
    g_w = jnp.log((m_xmax - m_xmin) / pw) / var1
    g_h = jnp.log((m_ymax - m_ymin) / ph) / var1
    loss_l_per = (_smooth_l1(loc[0:1, :] - g_cx) + _smooth_l1(loc[1:2, :] - g_cy)
                  + _smooth_l1(loc[2:3, :] - g_w) + _smooth_l1(loc[3:4, :] - g_h))     # (1, P)
    loss_l_sum = jnp.sum(jnp.where(pos, loss_l_per, 0.0), axis=1, keepdims=True)       # (1, 1)

    # ---- per-prior cross-entropy (lane-dense over C sublanes) ----------------
    cmax = jnp.max(conf, axis=0, keepdims=True)                                        # (1, P)
    lse = jnp.log(jnp.sum(jnp.exp(conf - cmax), axis=0, keepdims=True)) + cmax         # (1, P)
    cls_iota = lax.broadcasted_iota(jnp.int32, (C, P), 0).astype(f32)
    conf_gt = jnp.sum(jnp.where(cls_iota == conf_cls, conf, 0.0),
                      axis=0, keepdims=True)                                           # (1, P)
    loss_c_all = lse - conf_gt                                                         # (1, P)  (>= 0)
    mined = jnp.where(pos, 0.0, loss_c_all)                                            # (1, P)

    npos_f = jnp.sum(jnp.where(pos, 1.0, 0.0), axis=1, keepdims=True)                  # (1, 1)
    k_f = jnp.minimum(float(negpos_ratio) * npos_f, float(P - 1))                      # (1, 1) num_neg

    # ---- hard negative mining: sum of the top-num_neg mined losses -----------
    # The reference sums loss_c_all over (pos | neg) where `neg` is the rank-based
    # top-num_neg of `mined`.  Positives have mined == 0 and all ties at the cut
    # share the same value, so that sum equals
    #     sum_pos(loss_c_all) + sum(top num_neg values of mined)
    # regardless of tie-breaking.  A 32-step binary search on the int32 bit
    # patterns of the non-negative mined losses finds the num_neg-th largest
    # value exactly; the contribution of the ties is (num_neg - n_strict) * value.
    l_int = pltpu.bitcast(mined, jnp.int32)                                            # (1, P)

    def count_gt(t):
        return jnp.sum(jnp.where(l_int > t, 1.0, 0.0), axis=1, keepdims=True)          # (1, 1)

    lo0 = jnp.full((1, 1), -1, jnp.int32)
    hi0 = pltpu.bitcast(jnp.max(mined, axis=1, keepdims=True), jnp.int32)              # (1, 1)

    def val_body(_, carry):
        lo, hi = carry
        mid = lo + jnp.right_shift(hi - lo, 1)
        go_hi = count_gt(mid) < k_f
        return jnp.where(go_hi, lo, mid), jnp.where(go_hi, mid, hi)

    _, v_thr = lax.fori_loop(0, 32, val_body, (lo0, hi0))                              # (1, 1) int32

    v_thr_f = pltpu.bitcast(v_thr, f32)                                                # num_neg-th largest value
    n_strict = count_gt(v_thr)                                                         # (1, 1)
    strict_sum = jnp.sum(jnp.where(l_int > v_thr, mined, 0.0), axis=1, keepdims=True)  # (1, 1)
    top_k_sum = strict_sum + (k_f - n_strict) * v_thr_f                                # ties all equal v_thr_f
    top_k_sum = jnp.where(k_f >= 1.0, top_k_sum, 0.0)                                  # no mining when num_pos == 0

    loss_c_pos = jnp.sum(jnp.where(pos, loss_c_all, 0.0), axis=1, keepdims=True)       # (1, 1)
    loss_c_sum = loss_c_pos + top_k_sum                                                # (1, 1)

    # ---- single lane-dense output block per image ----------------------------
    lane = lax.broadcasted_iota(jnp.int32, (1, 128), 1)
    out_vec = (jnp.where(lane == 0, loss_l_sum, 0.0)
               + jnp.where(lane == 1, loss_c_sum, 0.0)
               + jnp.where(lane == 2, npos_f, 0.0))
    out_ref[0] = out_vec


def multibox_loss(loc_data, conf_data, priors, targets, *, num_classes,
                  overlap_thresh=0.5, negpos_ratio=3, variances=(0.1, 0.2)):
    """Returns (loss_l, loss_c) exactly like MultiBoxLoss.forward."""
    B, P, _ = loc_data.shape
    O = targets.shape[1]
    C = num_classes
    assert conf_data.shape == (B, P, C)

    # layout plumbing only: put P on the lane axis for the kernel
    loc_tr = jnp.transpose(loc_data.astype(jnp.float32), (0, 2, 1))     # (B, 4, P)
    conf_tr = jnp.transpose(conf_data.astype(jnp.float32), (0, 2, 1))   # (B, C, P)
    priors_tr = jnp.transpose(priors.astype(jnp.float32), (1, 0))       # (4, P)
    tgt = targets.astype(jnp.float32)                                    # (B, O, 5)

    kernel = functools.partial(
        _multibox_loss_kernel,
        threshold=float(overlap_thresh),
        var0=float(variances[0]),
        var1=float(variances[1]),
        negpos_ratio=int(negpos_ratio),
    )

    grid_spec = pltpu.PrefetchScalarGridSpec(
        num_scalar_prefetch=0,
        grid=(B,),
        in_specs=[
            pl.BlockSpec((1, 4, P), lambda b: (b, 0, 0)),
            pl.BlockSpec((1, C, P), lambda b: (b, 0, 0)),
            pl.BlockSpec((4, P), lambda b: (0, 0)),
            pl.BlockSpec((1, O, 5), lambda b: (b, 0, 0)),
        ],
        out_specs=pl.BlockSpec((1, 1, 128), lambda b: (b, 0, 0)),
    )

    out = pl.pallas_call(
        kernel,
        out_shape=jax.ShapeDtypeStruct((B, 1, 128), jnp.float32),
        grid_spec=grid_spec,
        compiler_params=pltpu.CompilerParams(
            dimension_semantics=("parallel",),       # per-image work is independent
            vmem_limit_bytes=32 * 1024 * 1024),
    )(loc_tr, conf_tr, priors_tr, tgt)

    loss_l_b = out[:, 0, 0]
    loss_c_b = out[:, 0, 1]
    npos_b = out[:, 0, 2]
    n = jnp.sum(npos_b)          # NOTE: divides by N like the original (NaN if N == 0)
    loss_l = jnp.sum(loss_l_b) / n
    loss_c = jnp.sum(loss_c_b) / n
    return loss_l, loss_c


def _reference_multibox_loss(loc_data, conf_data, priors, targets,
                             num_classes, threshold, variances, negpos_ratio):
    """Pure numpy mirror of the PyTorch MultiBoxLoss.forward."""
    num, P, _ = loc_data.shape
    loc_t = np.zeros((num, P, 4), np.float64)
    conf_t = np.zeros((num, P), np.int64)
    pf = np.concatenate([priors[:, :2] - priors[:, 2:] / 2,
                         priors[:, :2] + priors[:, 2:] / 2], axis=1)
    for idx in range(num):
        truths = targets[idx][:, :4].astype(np.float64)
        labels = targets[idx][:, 4].astype(np.float64)
        O = truths.shape[0]
        ixmin = np.maximum(truths[:, None, 0], pf[None, :, 0])
        iymin = np.maximum(truths[:, None, 1], pf[None, :, 1])
        ixmax = np.minimum(truths[:, None, 2], pf[None, :, 2])
        iymax = np.minimum(truths[:, None, 3], pf[None, :, 3])
        inter = np.clip(ixmax - ixmin, 0, None) * np.clip(iymax - iymin, 0, None)
        area_t = ((truths[:, 2] - truths[:, 0]) * (truths[:, 3] - truths[:, 1]))[:, None]
        area_p = ((pf[:, 2] - pf[:, 0]) * (pf[:, 3] - pf[:, 1]))[None, :]
        overlaps = inter / (area_t + area_p - inter)
        best_prior_idx = overlaps.argmax(1)
        best_truth_overlap = overlaps.max(0)
        best_truth_idx = overlaps.argmax(0)
        best_truth_overlap[best_prior_idx] = 2.0
        for j in range(O):
            best_truth_idx[best_prior_idx[j]] = j
        matches = truths[best_truth_idx]
        conf = labels[best_truth_idx] + 1
        conf[best_truth_overlap < threshold] = 0
        g_cxcy = ((matches[:, :2] + matches[:, 2:]) / 2 - priors[:, :2]) / (variances[0] * priors[:, 2:])
        g_wh = np.log((matches[:, 2:] - matches[:, :2]) / priors[:, 2:]) / variances[1]
        loc_t[idx] = np.concatenate([g_cxcy, g_wh], axis=1)
        conf_t[idx] = conf.astype(np.int64)
    pos = conf_t > 0
    d = loc_data.astype(np.float64) - loc_t
    sl1 = np.where(np.abs(d) < 1.0, 0.5 * d * d, np.abs(d) - 0.5)
    loss_l = float(np.sum(sl1 * pos[..., None]))
    bc = conf_data.reshape(-1, num_classes).astype(np.float64)
    m = bc.max(axis=1, keepdims=True)
    lse = np.log(np.exp(bc - m).sum(1, keepdims=True)) + m
    gt = np.take_along_axis(bc, conf_t.reshape(-1, 1), axis=1)
    loss_c_all = (lse - gt).reshape(num, P)
    loss_c_mined = np.where(pos, 0.0, loss_c_all)
    num_pos = pos.sum(1)
    num_neg = np.minimum(negpos_ratio * num_pos, P - 1)
    order = np.argsort(-loss_c_mined, axis=1, kind="stable")
    rank = np.empty_like(order)
    rows = np.tile(np.arange(P)[None, :], (num, 1))
    np.put_along_axis(rank, order, rows, axis=1)
    neg = rank < num_neg[:, None]
    sel = pos | neg
    loss_c = float(np.sum(np.where(sel, loss_c_all, 0.0)))
    n = float(num_pos.sum())
    return loss_l / n, loss_c / n


if __name__ == "__main__":
    B, P, C, O = 2, 128, 8, 4  # batch, num_priors, num_classes, num_objs per image
    key = jax.random.PRNGKey(0)
    k1, k2, k3, k4, k5, k6 = jax.random.split(key, 6)

    loc_data = 0.5 * jax.random.normal(k1, (B, P, 4), jnp.float32)
    conf_data = jax.random.normal(k2, (B, P, C), jnp.float32)

    # priors: center-form boxes inside the unit square
    p_cxy = jax.random.uniform(k3, (P, 2), minval=0.15, maxval=0.85)
    p_wh = jax.random.uniform(k4, (P, 2), minval=0.10, maxval=0.30)
    priors = jnp.concatenate([p_cxy, p_wh], axis=1).astype(jnp.float32)

    # targets: [xmin, ymin, xmax, ymax, label] per ground-truth object
    t_c = jax.random.uniform(k5, (B, O, 2), minval=0.25, maxval=0.75)
    t_s = jax.random.uniform(k6, (B, O, 2), minval=0.08, maxval=0.20)
    labels = (jnp.arange(B * O).reshape(B, O, 1) % (C - 1)).astype(jnp.float32)
    targets = jnp.concatenate([t_c - t_s, t_c + t_s, labels], axis=2).astype(jnp.float32)

    loss_l, loss_c = multibox_loss(
        loc_data, conf_data, priors, targets,
        num_classes=C, overlap_thresh=0.5, negpos_ratio=3, variances=(0.1, 0.2))
    (loss_l, loss_c) = jax.block_until_ready((loss_l, loss_c))

    ref_l, ref_c = _reference_multibox_loss(
        np.asarray(loc_data), np.asarray(conf_data), np.asarray(priors),
        np.asarray(targets), C, 0.5, (0.1, 0.2), 3)

    assert np.isfinite(float(loss_l)) and np.isfinite(float(loss_c))
    np.testing.assert_allclose(float(loss_l), ref_l, rtol=5e-3, atol=1e-3)
    np.testing.assert_allclose(float(loss_c), ref_c, rtol=5e-3, atol=1e-3)
    print("KERNEL_OK")
</pallas_src>

<mosaic_0001>
module attributes {stable_mosaic.version = 11 : i64} {
  func.func @_multibox_loss_kernel(%arg0: i32, %arg1: memref<1x4x128xf32, #tpu.memory_space<vmem>>, %arg2: memref<1x8x128xf32, #tpu.memory_space<vmem>>, %arg3: memref<4x128xf32, #tpu.memory_space<vmem>>, %arg4: memref<1x4x5xf32, #tpu.memory_space<vmem>>, %arg5: memref<1x1x128xf32, #tpu.memory_space<vmem>>) attributes {dimension_semantics = [#tpu.dimension_semantics<parallel>], iteration_bounds = array<i64: 2>, scalar_prefetch = 0 : i64, scratch_operands = 0 : i64, tpu.core_type = #tpu.core_type<tc>, window_params = [{transform_indices = @transform_0, window_bounds = array<i64: 1, 4, 128>}, {transform_indices = @transform_1, window_bounds = array<i64: 1, 8, 128>}, {pipeline_mode = #tpu.pipeline_mode<synchronous>, transform_indices = @transform_2, window_bounds = array<i64: 4, 128>}, {transform_indices = @transform_3, window_bounds = array<i64: 1, 4, 5>}, {transform_indices = @transform_4, window_bounds = array<i64: 1, 1, 128>}]} {
    %c0 = arith.constant 0 : index
    %c0_0 = arith.constant 0 : index
    %c0_1 = arith.constant 0 : index
    %0 = vector.load %arg1[%c0, %c0_0, %c0_1] : memref<1x4x128xf32, #tpu.memory_space<vmem>>, vector<1x4x128xf32>
    %1 = vector.shape_cast %0 : vector<1x4x128xf32> to vector<4x128xf32>
    %c0_2 = arith.constant 0 : index
    %c0_3 = arith.constant 0 : index
    %c0_4 = arith.constant 0 : index
    %2 = vector.load %arg2[%c0_2, %c0_3, %c0_4] : memref<1x8x128xf32, #tpu.memory_space<vmem>>, vector<1x8x128xf32>
    %3 = vector.shape_cast %2 : vector<1x8x128xf32> to vector<8x128xf32>
    %c0_5 = arith.constant 0 : index
    %c0_6 = arith.constant 0 : index
    %4 = vector.load %arg3[%c0_5, %c0_6] : memref<4x128xf32, #tpu.memory_space<vmem>>, vector<4x128xf32>
    %c0_7 = arith.constant 0 : index
    %c0_8 = arith.constant 0 : index
    %c0_9 = arith.constant 0 : index
    %5 = vector.load %arg4[%c0_7, %c0_8, %c0_9] : memref<1x4x5xf32, #tpu.memory_space<vmem>>, vector<1x4x5xf32>
    %6 = vector.shape_cast %5 : vector<1x4x5xf32> to vector<4x5xf32>
    %7 = vector.extract_strided_slice %4 {offsets = [0, 0], sizes = [1, 128], strides = [1, 1]} : vector<4x128xf32> to vector<1x128xf32>
    %8 = vector.extract_strided_slice %4 {offsets = [1, 0], sizes = [1, 128], strides = [1, 1]} : vector<4x128xf32> to vector<1x128xf32>
    %9 = vector.extract_strided_slice %4 {offsets = [2, 0], sizes = [1, 128], strides = [1, 1]} : vector<4x128xf32> to vector<1x128xf32>
    %10 = vector.extract_strided_slice %4 {offsets = [3, 0], sizes = [1, 128], strides = [1, 1]} : vector<4x128xf32> to vector<1x128xf32>
    %cst = arith.constant 5.000000e-01 : f32
    %11 = vector.broadcast %cst : f32 to vector<1x128xf32>
    %12 = arith.mulf %11, %9 : vector<1x128xf32>
    %13 = arith.subf %7, %12 : vector<1x128xf32>
    %cst_10 = arith.constant 5.000000e-01 : f32
    %14 = vector.broadcast %cst_10 : f32 to vector<1x128xf32>
    %15 = arith.mulf %14, %10 : vector<1x128xf32>
    %16 = arith.subf %8, %15 : vector<1x128xf32>
    %cst_11 = arith.constant 5.000000e-01 : f32
    %17 = vector.broadcast %cst_11 : f32 to vector<1x128xf32>
    %18 = arith.mulf %17, %9 : vector<1x128xf32>
    %19 = arith.addf %7, %18 : vector<1x128xf32>
    %cst_12 = arith.constant 5.000000e-01 : f32
    %20 = vector.broadcast %cst_12 : f32 to vector<1x128xf32>
    %21 = arith.mulf %20, %10 : vector<1x128xf32>
    %22 = arith.addf %8, %21 : vector<1x128xf32>
    %23 = vector.extract_strided_slice %6 {offsets = [0, 0], sizes = [4, 1], strides = [1, 1]} : vector<4x5xf32> to vector<4x1xf32>
    %24 = vector.extract_strided_slice %6 {offsets = [0, 1], sizes = [4, 1], strides = [1, 1]} : vector<4x5xf32> to vector<4x1xf32>
    %25 = vector.extract_strided_slice %6 {offsets = [0, 2], sizes = [4, 1], strides = [1, 1]} : vector<4x5xf32> to vector<4x1xf32>
    %26 = vector.extract_strided_slice %6 {offsets = [0, 3], sizes = [4, 1], strides = [1, 1]} : vector<4x5xf32> to vector<4x1xf32>
    %27 = vector.extract_strided_slice %6 {offsets = [0, 4], sizes = [4, 1], strides = [1, 1]} : vector<4x5xf32> to vector<4x1xf32>
    %28 = vector.broadcast %25 : vector<4x1xf32> to vector<4x128xf32>
    %29 = vector.broadcast %19 : vector<1x128xf32> to vector<4x128xf32>
    %30 = arith.minimumf %28, %29 : vector<4x128xf32>
    %31 = vector.broadcast %23 : vector<4x1xf32> to vector<4x128xf32>
    %32 = vector.broadcast %13 : vector<1x128xf32> to vector<4x128xf32>
    %33 = arith.maximumf %31, %32 : vector<4x128xf32>
    %34 = arith.subf %30, %33 : vector<4x128xf32>
    %cst_13 = arith.constant 0.000000e+00 : f32
    %35 = vector.broadcast %cst_13 : f32 to vector<4x128xf32>
    %36 = arith.maximumf %34, %35 : vector<4x128xf32>
    %37 = vector.broadcast %26 : vector<4x1xf32> to vector<4x128xf32>
    %38 = vector.broadcast %22 : vector<1x128xf32> to vector<4x128xf32>
    %39 = arith.minimumf %37, %38 : vector<4x128xf32>
    %40 = vector.broadcast %24 : vector<4x1xf32> to vector<4x128xf32>
    %41 = vector.broadcast %16 : vector<1x128xf32> to vector<4x128xf32>
    %42 = arith.maximumf %40, %41 : vector<4x128xf32>
    %43 = arith.subf %39, %42 : vector<4x128xf32>
    %cst_14 = arith.constant 0.000000e+00 : f32
    %44 = vector.broadcast %cst_14 : f32 to vector<4x128xf32>
    %45 = arith.maximumf %43, %44 : vector<4x128xf32>
    %46 = arith.mulf %36, %45 : vector<4x128xf32>
    %47 = arith.subf %25, %23 : vector<4x1xf32>
    %48 = arith.subf %26, %24 : vector<4x1xf32>
    %49 = arith.mulf %47, %48 : vector<4x1xf32>
    %50 = arith.subf %19, %13 : vector<1x128xf32>
    %51 = arith.subf %22, %16 : vector<1x128xf32>
    %52 = arith.mulf %50, %51 : vector<1x128xf32>
    %53 = vector.broadcast %49 : vector<4x1xf32> to vector<4x128xf32>
    %54 = vector.broadcast %52 : vector<1x128xf32> to vector<4x128xf32>
    %55 = arith.addf %53, %54 : vector<4x128xf32>
    %56 = arith.subf %55, %46 : vector<4x128xf32>
    %57 = arith.divf %46, %56 : vector<4x128xf32>
    %58 = tpu.iota {dimensions = array<i32: 1>} : vector<4x128xi32>
    %59 = arith.sitofp %58 : vector<4x128xi32> to vector<4x128xf32>
    %60 = tpu.iota {dimensions = array<i32: 0>} : vector<4x128xi32>
    %61 = arith.sitofp %60 : vector<4x128xi32> to vector<4x128xf32>
    %cst_15 = arith.constant dense<0xFF800000> : vector<4xf32>
    %62 = vector.multi_reduction <maximumf>, %57, %cst_15 [1] : vector<4x128xf32> to vector<4xf32>
    %63 = vector.shape_cast %62 : vector<4xf32> to vector<4x1xf32>
    %64 = vector.broadcast %63 : vector<4x1xf32> to vector<4x128xf32>
    %65 = arith.cmpf oeq, %57, %64 : vector<4x128xf32>
    %cst_16 = arith.constant 1.280000e+02 : f32
    %66 = vector.broadcast %cst_16 : f32 to vector<4x128xf32>
    %67 = arith.select %65, %59, %66 : vector<4x128xi1>, vector<4x128xf32>
    %cst_17 = arith.constant dense<0x7F800000> : vector<4xf32>
    %68 = vector.multi_reduction <minimumf>, %67, %cst_17 [1] : vector<4x128xf32> to vector<4xf32>
    %69 = vector.shape_cast %68 : vector<4xf32> to vector<4x1xf32>
    %cst_18 = arith.constant dense<0xFF800000> : vector<128xf32>
    %70 = vector.multi_reduction <maximumf>, %57, %cst_18 [0] : vector<4x128xf32> to vector<128xf32>
    %71 = vector.shape_cast %70 : vector<128xf32> to vector<1x128xf32>
    %72 = vector.broadcast %71 : vector<1x128xf32> to vector<4x128xf32>
    %73 = arith.cmpf oeq, %57, %72 : vector<4x128xf32>
    %cst_19 = arith.constant 4.000000e+00 : f32
    %74 = vector.broadcast %cst_19 : f32 to vector<4x128xf32>
    %75 = arith.select %73, %61, %74 : vector<4x128xi1>, vector<4x128xf32>
    %cst_20 = arith.constant dense<0x7F800000> : vector<128xf32>
    %76 = vector.multi_reduction <minimumf>, %75, %cst_20 [0] : vector<4x128xf32> to vector<128xf32>
    %77 = vector.shape_cast %76 : vector<128xf32> to vector<1x128xf32>
    %78 = vector.broadcast %69 : vector<4x1xf32> to vector<4x128xf32>
    %79 = arith.cmpf oeq, %78, %59 : vector<4x128xf32>
    %cst_21 = arith.constant 1.000000e+00 : f32
    %cst_22 = arith.constant 0.000000e+00 : f32
    %80 = vector.broadcast %cst_21 : f32 to vector<4x128xf32>
    %81 = vector.broadcast %cst_22 : f32 to vector<4x128xf32>
    %82 = arith.select %79, %80, %81 : vector<4x128xi1>, vector<4x128xf32>
    %cst_23 = arith.constant dense<0xFF800000> : vector<128xf32>
    %83 = vector.multi_reduction <maximumf>, %82, %cst_23 [0] : vector<4x128xf32> to vector<128xf32>
    %84 = vector.shape_cast %83 : vector<128xf32> to vector<1x128xf32>
    %cst_24 = arith.constant 5.000000e-01 : f32
    %85 = vector.broadcast %cst_24 : f32 to vector<1x128xf32>
    %86 = arith.cmpf ogt, %84, %85 : vector<1x128xf32>
    %cst_25 = arith.constant -1.000000e+00 : f32
    %87 = vector.broadcast %cst_25 : f32 to vector<4x128xf32>
    %88 = arith.select %79, %61, %87 : vector<4x128xi1>, vector<4x128xf32>
    %cst_26 = arith.constant dense<0xFF800000> : vector<128xf32>
    %89 = vector.multi_reduction <maximumf>, %88, %cst_26 [0] : vector<4x128xf32> to vector<128xf32>
    %90 = vector.shape_cast %89 : vector<128xf32> to vector<1x128xf32>
    %91 = arith.select %86, %90, %77 : vector<1x128xi1>, vector<1x128xf32>
    %cst_27 = arith.constant 2.000000e+00 : f32
    %92 = vector.broadcast %cst_27 : f32 to vector<1x128xf32>
    %93 = arith.select %86, %92, %71 : vector<1x128xi1>, vector<1x128xf32>
    %94 = vector.broadcast %91 : vector<1x128xf32> to vector<4x128xf32>
    %95 = arith.cmpf oeq, %61, %94 : vector<4x128xf32>
    %96 = arith.extui %95 : vector<4x128xi1> to vector<4x128xi32>
    %97 = arith.sitofp %96 : vector<4x128xi32> to vector<4x128xf32>
    %98 = vector.broadcast %23 : vector<4x1xf32> to vector<4x128xf32>
    %99 = arith.mulf %97, %98 : vector<4x128xf32>
    %cst_28 = arith.constant dense<0.000000e+00> : vector<128xf32>
    %100 = vector.multi_reduction <add>, %99, %cst_28 [0] : vector<4x128xf32> to vector<128xf32>
    %101 = vector.shape_cast %100 : vector<128xf32> to vector<1x128xf32>
    %102 = vector.broadcast %24 : vector<4x1xf32> to vector<4x128xf32>
    %103 = arith.mulf %97, %102 : vector<4x128xf32>
    %cst_29 = arith.constant dense<0.000000e+00> : vector<128xf32>
    %104 = vector.multi_reduction <add>, %103, %cst_29 [0] : vector<4x128xf32> to vector<128xf32>
    %105 = vector.shape_cast %104 : vector<128xf32> to vector<1x128xf32>
    %106 = vector.broadcast %25 : vector<4x1xf32> to vector<4x128xf32>
    %107 = arith.mulf %97, %106 : vector<4x128xf32>
    %cst_30 = arith.constant dense<0.000000e+00> : vector<128xf32>
    %108 = vector.multi_reduction <add>, %107, %cst_30 [0] : vector<4x128xf32> to vector<128xf32>
    %109 = vector.shape_cast %108 : vector<128xf32> to vector<1x128xf32>
    %110 = vector.broadcast %26 : vector<4x1xf32> to vector<4x128xf32>
    %111 = arith.mulf %97, %110 : vector<4x128xf32>
    %cst_31 = arith.constant dense<0.000000e+00> : vector<128xf32>
    %112 = vector.multi_reduction <add>, %111, %cst_31 [0] : vector<4x128xf32> to vector<128xf32>
    %113 = vector.shape_cast %112 : vector<128xf32> to vector<1x128xf32>
    %114 = vector.broadcast %27 : vector<4x1xf32> to vector<4x128xf32>
    %115 = arith.mulf %97, %114 : vector<4x128xf32>
    %cst_32 = arith.constant dense<0.000000e+00> : vector<128xf32>
    %116 = vector.multi_reduction <add>, %115, %cst_32 [0] : vector<4x128xf32> to vector<128xf32>
    %117 = vector.shape_cast %116 : vector<128xf32> to vector<1x128xf32>
    %cst_33 = arith.constant 5.000000e-01 : f32
    %118 = vector.broadcast %cst_33 : f32 to vector<1x128xf32>
    %119 = arith.cmpf olt, %93, %118 : vector<1x128xf32>
    %cst_34 = arith.constant 1.000000e+00 : f32
    %120 = vector.broadcast %cst_34 : f32 to vector<1x128xf32>
    %121 = arith.addf %117, %120 : vector<1x128xf32>
    %cst_35 = arith.constant 0.000000e+00 : f32
    %122 = vector.broadcast %cst_35 : f32 to vector<1x128xf32>
    %123 = arith.select %119, %122, %121 : vector<1x128xi1>, vector<1x128xf32>
    %cst_36 = arith.constant 5.000000e-01 : f32
    %124 = vector.broadcast %cst_36 : f32 to vector<1x128xf32>
    %125 = arith.cmpf ogt, %123, %124 : vector<1x128xf32>
    %126 = arith.addf %101, %109 : vector<1x128xf32>
    %cst_37 = arith.constant 5.000000e-01 : f32
    %127 = vector.broadcast %cst_37 : f32 to vector<1x128xf32>
    %128 = arith.mulf %126, %127 : vector<1x128xf32>
    %129 = arith.subf %128, %7 : vector<1x128xf32>
    %cst_38 = arith.constant 1.000000e-01 : f32
    %130 = vector.broadcast %cst_38 : f32 to vector<1x128xf32>
    %131 = arith.mulf %130, %9 : vector<1x128xf32>
    %132 = arith.divf %129, %131 : vector<1x128xf32>
    %133 = arith.addf %105, %113 : vector<1x128xf32>
    %cst_39 = arith.constant 5.000000e-01 : f32
    %134 = vector.broadcast %cst_39 : f32 to vector<1x128xf32>
    %135 = arith.mulf %133, %134 : vector<1x128xf32>
    %136 = arith.subf %135, %8 : vector<1x128xf32>
    %cst_40 = arith.constant 1.000000e-01 : f32
    %137 = vector.broadcast %cst_40 : f32 to vector<1x128xf32>
    %138 = arith.mulf %137, %10 : vector<1x128xf32>
    %139 = arith.divf %136, %138 : vector<1x128xf32>
    %140 = arith.subf %109, %101 : vector<1x128xf32>
    %141 = arith.divf %140, %9 : vector<1x128xf32>
    %142 = math.log %141 : vector<1x128xf32>
    %cst_41 = arith.constant 2.000000e-01 : f32
    %143 = vector.broadcast %cst_41 : f32 to vector<1x128xf32>
    %144 = arith.divf %142, %143 : vector<1x128xf32>
    %145 = arith.subf %113, %105 : vector<1x128xf32>
    %146 = arith.divf %145, %10 : vector<1x128xf32>
    %147 = math.log %146 : vector<1x128xf32>
    %cst_42 = arith.constant 2.000000e-01 : f32
    %148 = vector.broadcast %cst_42 : f32 to vector<1x128xf32>
    %149 = arith.divf %147, %148 : vector<1x128xf32>
    %150 = vector.extract_strided_slice %1 {offsets = [0, 0], sizes = [1, 128], strides = [1, 1]} : vector<4x128xf32> to vector<1x128xf32>
    %151 = arith.subf %150, %132 : vector<1x128xf32>
    %152 = math.absf %151 : vector<1x128xf32>
    %cst_43 = arith.constant 1.000000e+00 : f32
    %153 = vector.broadcast %cst_43 : f32 to vector<1x128xf32>
    %154 = arith.cmpf olt, %152, %153 : vector<1x128xf32>
    %cst_44 = arith.constant 5.000000e-01 : f32
    %155 = vector.broadcast %cst_44 : f32 to vector<1x128xf32>
    %156 = arith.mulf %155, %151 : vector<1x128xf32>
    %157 = arith.mulf %156, %151 : vector<1x128xf32>
    %cst_45 = arith.constant 5.000000e-01 : f32
    %158 = vector.broadcast %cst_45 : f32 to vector<1x128xf32>
    %159 = arith.subf %152, %158 : vector<1x128xf32>
    %160 = arith.select %154, %157, %159 : vector<1x128xi1>, vector<1x128xf32>
    %161 = vector.extract_strided_slice %1 {offsets = [1, 0], sizes = [1, 128], strides = [1, 1]} : vector<4x128xf32> to vector<1x128xf32>
    %162 = arith.subf %161, %139 : vector<1x128xf32>
    %163 = math.absf %162 : vector<1x128xf32>
    %cst_46 = arith.constant 1.000000e+00 : f32
    %164 = vector.broadcast %cst_46 : f32 to vector<1x128xf32>
    %165 = arith.cmpf olt, %163, %164 : vector<1x128xf32>
    %cst_47 = arith.constant 5.000000e-01 : f32
    %166 = vector.broadcast %cst_47 : f32 to vector<1x128xf32>
    %167 = arith.mulf %166, %162 : vector<1x128xf32>
    %168 = arith.mulf %167, %162 : vector<1x128xf32>
    %cst_48 = arith.constant 5.000000e-01 : f32
    %169 = vector.broadcast %cst_48 : f32 to vector<1x128xf32>
    %170 = arith.subf %163, %169 : vector<1x128xf32>
    %171 = arith.select %165, %168, %170 : vector<1x128xi1>, vector<1x128xf32>
    %172 = arith.addf %160, %171 : vector<1x128xf32>
    %173 = vector.extract_strided_slice %1 {offsets = [2, 0], sizes = [1, 128], strides = [1, 1]} : vector<4x128xf32> to vector<1x128xf32>
    %174 = arith.subf %173, %144 : vector<1x128xf32>
    %175 = math.absf %174 : vector<1x128xf32>
    %cst_49 = arith.constant 1.000000e+00 : f32
    %176 = vector.broadcast %cst_49 : f32 to vector<1x128xf32>
    %177 = arith.cmpf olt, %175, %176 : vector<1x128xf32>
    %cst_50 = arith.constant 5.000000e-01 : f32
    %178 = vector.broadcast %cst_50 : f32 to vector<1x128xf32>
    %179 = arith.mulf %178, %174 : vector<1x128xf32>
    %180 = arith.mulf %179, %174 : vector<1x128xf32>
    %cst_51 = arith.constant 5.000000e-01 : f32
    %181 = vector.broadcast %cst_51 : f32 to vector<1x128xf32>
    %182 = arith.subf %175, %181 : vector<1x128xf32>
    %183 = arith.select %177, %180, %182 : vector<1x128xi1>, vector<1x128xf32>
    %184 = arith.addf %172, %183 : vector<1x128xf32>
    %185 = vector.extract_strided_slice %1 {offsets = [3, 0], sizes = [1, 128], strides = [1, 1]} : vector<4x128xf32> to vector<1x128xf32>
    %186 = arith.subf %185, %149 : vector<1x128xf32>
    %187 = math.absf %186 : vector<1x128xf32>
    %cst_52 = arith.constant 1.000000e+00 : f32
    %188 = vector.broadcast %cst_52 : f32 to vector<1x128xf32>
    %189 = arith.cmpf olt, %187, %188 : vector<1x128xf32>
    %cst_53 = arith.constant 5.000000e-01 : f32
    %190 = vector.broadcast %cst_53 : f32 to vector<1x128xf32>
    %191 = arith.mulf %190, %186 : vector<1x128xf32>
    %192 = arith.mulf %191, %186 : vector<1x128xf32>
    %cst_54 = arith.constant 5.000000e-01 : f32
    %193 = vector.broadcast %cst_54 : f32 to vector<1x128xf32>
    %194 = arith.subf %187, %193 : vector<1x128xf32>
    %195 = arith.select %189, %192, %194 : vector<1x128xi1>, vector<1x128xf32>
    %196 = arith.addf %184, %195 : vector<1x128xf32>
    %cst_55 = arith.constant 0.000000e+00 : f32
    %197 = vector.broadcast %cst_55 : f32 to vector<1x128xf32>
    %198 = arith.select %125, %196, %197 : vector<1x128xi1>, vector<1x128xf32>
    %cst_56 = arith.constant dense<0.000000e+00> : vector<1xf32>
    %199 = vector.multi_reduction <add>, %198, %cst_56 [1] : vector<1x128xf32> to vector<1xf32>
    %200 = vector.shape_cast %199 : vector<1xf32> to vector<1x1xf32>
    %cst_57 = arith.constant dense<0xFF800000> : vector<128xf32>
    %201 = vector.multi_reduction <maximumf>, %3, %cst_57 [0] : vector<8x128xf32> to vector<128xf32>
    %202 = vector.shape_cast %201 : vector<128xf32> to vector<1x128xf32>
    %203 = vector.broadcast %202 : vector<1x128xf32> to vector<8x128xf32>
    %204 = arith.subf %3, %203 : vector<8x128xf32>
    %205 = math.exp %204 : vector<8x128xf32>
    %cst_58 = arith.constant dense<0.000000e+00> : vector<128xf32>
    %206 = vector.multi_reduction <add>, %205, %cst_58 [0] : vector<8x128xf32> to vector<128xf32>
    %207 = vector.shape_cast %206 : vector<128xf32> to vector<1x128xf32>
    %208 = math.log %207 : vector<1x128xf32>
    %209 = arith.addf %208, %202 : vector<1x128xf32>
    %210 = tpu.iota {dimensions = array<i32: 0>} : vector<8x128xi32>
    %211 = arith.sitofp %210 : vector<8x128xi32> to vector<8x128xf32>
    %212 = vector.broadcast %123 : vector<1x128xf32> to vector<8x128xf32>
    %213 = arith.cmpf oeq, %211, %212 : vector<8x128xf32>
    %cst_59 = arith.constant 0.000000e+00 : f32
    %214 = vector.broadcast %cst_59 : f32 to vector<8x128xf32>
    %215 = arith.select %213, %3, %214 : vector<8x128xi1>, vector<8x128xf32>
    %cst_60 = arith.constant dense<0.000000e+00> : vector<128xf32>
    %216 = vector.multi_reduction <add>, %215, %cst_60 [0] : vector<8x128xf32> to vector<128xf32>
    %217 = vector.shape_cast %216 : vector<128xf32> to vector<1x128xf32>
    %218 = arith.subf %209, %217 : vector<1x128xf32>
    %cst_61 = arith.constant 0.000000e+00 : f32
    %219 = vector.broadcast %cst_61 : f32 to vector<1x128xf32>
    %220 = arith.select %125, %219, %218 : vector<1x128xi1>, vector<1x128xf32>
    %cst_62 = arith.constant 1.000000e+00 : f32
    %cst_63 = arith.constant 0.000000e+00 : f32
    %221 = vector.broadcast %cst_62 : f32 to vector<1x128xf32>
    %222 = vector.broadcast %cst_63 : f32 to vector<1x128xf32>
    %223 = arith.select %125, %221, %222 : vector<1x128xi1>, vector<1x128xf32>
    %cst_64 = arith.constant dense<0.000000e+00> : vector<1xf32>
    %224 = vector.multi_reduction <add>, %223, %cst_64 [1] : vector<1x128xf32> to vector<1xf32>
    %225 = vector.shape_cast %224 : vector<1xf32> to vector<1x1xf32>
    %cst_65 = arith.constant 3.000000e+00 : f32
    %226 = vector.broadcast %cst_65 : f32 to vector<1x1xf32>
    %227 = arith.mulf %226, %225 : vector<1x1xf32>
    %cst_66 = arith.constant 1.270000e+02 : f32
    %228 = vector.broadcast %cst_66 : f32 to vector<1x1xf32>
    %229 = arith.minimumf %227, %228 : vector<1x1xf32>
    %230 = tpu.bitcast %220 : vector<1x128xf32> -> vector<1x128xi32>
    %c-1_i32 = arith.constant -1 : i32
    %231 = vector.broadcast %c-1_i32 : i32 to vector<1x1xi32>
    %cst_67 = arith.constant dense<0xFF800000> : vector<1xf32>
    %232 = vector.multi_reduction <maximumf>, %220, %cst_67 [1] : vector<1x128xf32> to vector<1xf32>
    %233 = vector.shape_cast %232 : vector<1xf32> to vector<1x1xf32>
    %234 = tpu.bitcast %233 : vector<1x1xf32> -> vector<1x1xi32>
    %c0_i32 = arith.constant 0 : i32
    %c32_i32 = arith.constant 32 : i32
    %235 = arith.addi %c0_i32, %c32_i32 : i32
    %c1_i32 = arith.constant 1 : i32
    %236:2 = scf.for %arg6 = %c0_i32 to %235 step %c1_i32 iter_args(%arg7 = %231, %arg8 = %234) -> (vector<1x1xi32>, vector<1x1xi32>)  : i32 {
      %287 = arith.subi %arg8, %arg7 : vector<1x1xi32>
      %c1_i32_85 = arith.constant 1 : i32
      %288 = vector.broadcast %c1_i32_85 : i32 to vector<1x1xi32>
      %289 = arith.shrsi %287, %288 : vector<1x1xi32>
      %290 = arith.addi %arg7, %289 : vector<1x1xi32>
      %291 = vector.broadcast %290 : vector<1x1xi32> to vector<1x128xi32>
      %292 = arith.cmpi sgt, %230, %291 : vector<1x128xi32>
      %cst_86 = arith.constant 1.000000e+00 : f32
      %cst_87 = arith.constant 0.000000e+00 : f32
      %293 = vector.broadcast %cst_86 : f32 to vector<1x128xf32>
      %294 = vector.broadcast %cst_87 : f32 to vector<1x128xf32>
      %295 = arith.select %292, %293, %294 : vector<1x128xi1>, vector<1x128xf32>
      %cst_88 = arith.constant dense<0.000000e+00> : vector<1xf32>
      %296 = vector.multi_reduction <add>, %295, %cst_88 [1] : vector<1x128xf32> to vector<1xf32>
      %297 = vector.shape_cast %296 : vector<1xf32> to vector<1x1xf32>
      %298 = arith.cmpf olt, %297, %229 : vector<1x1xf32>
      %299 = arith.select %298, %arg7, %290 : vector<1x1xi1>, vector<1x1xi32>
      %300 = arith.select %298, %290, %arg8 : vector<1x1xi1>, vector<1x1xi32>
      scf.yield %299, %300 : vector<1x1xi32>, vector<1x1xi32>
    }
    %237 = tpu.bitcast %236#1 : vector<1x1xi32> -> vector<1x1xf32>
    %238 = vector.broadcast %236#1 : vector<1x1xi32> to vector<1x128xi32>
    %239 = arith.cmpi sgt, %230, %238 : vector<1x128xi32>
    %cst_68 = arith.constant 1.000000e+00 : f32
    %cst_69 = arith.constant 0.000000e+00 : f32
    %240 = vector.broadcast %cst_68 : f32 to vector<1x128xf32>
    %241 = vector.broadcast %cst_69 : f32 to vector<1x128xf32>
    %242 = arith.select %239, %240, %241 : vector<1x128xi1>, vector<1x128xf32>
    %cst_70 = arith.constant dense<0.000000e+00> : vector<1xf32>
    %243 = vector.multi_reduction <add>, %242, %cst_70 [1] : vector<1x128xf32> to vector<1xf32>
    %244 = vector.shape_cast %243 : vector<1xf32> to vector<1x1xf32>
    %245 = vector.broadcast %236#1 : vector<1x1xi32> to vector<1x128xi32>
    %246 = arith.cmpi sgt, %230, %245 : vector<1x128xi32>
    %cst_71 = arith.constant 0.000000e+00 : f32
    %247 = vector.broadcast %cst_71 : f32 to vector<1x128xf32>
    %248 = arith.select %246, %220, %247 : vector<1x128xi1>, vector<1x128xf32>
    %cst_72 = arith.constant dense<0.000000e+00> : vector<1xf32>
    %249 = vector.multi_reduction <add>, %248, %cst_72 [1] : vector<1x128xf32> to vector<1xf32>
    %250 = vector.shape_cast %249 : vector<1xf32> to vector<1x1xf32>
    %251 = arith.subf %229, %244 : vector<1x1xf32>
    %252 = arith.mulf %251, %237 : vector<1x1xf32>
    %253 = arith.addf %250, %252 : vector<1x1xf32>
    %cst_73 = arith.constant 1.000000e+00 : f32
    %254 = vector.broadcast %cst_73 : f32 to vector<1x1xf32>
    %255 = arith.cmpf oge, %229, %254 : vector<1x1xf32>
    %cst_74 = arith.constant 0.000000e+00 : f32
    %256 = vector.broadcast %cst_74 : f32 to vector<1x1xf32>
    %257 = arith.select %255, %253, %256 : vector<1x1xi1>, vector<1x1xf32>
    %cst_75 = arith.constant 0.000000e+00 : f32
    %258 = vector.broadcast %cst_75 : f32 to vector<1x128xf32>
    %259 = arith.select %125, %218, %258 : vector<1x128xi1>, vector<1x128xf32>
    %cst_76 = arith.constant dense<0.000000e+00> : vector<1xf32>
    %260 = vector.multi_reduction <add>, %259, %cst_76 [1] : vector<1x128xf32> to vector<1xf32>
    %261 = vector.shape_cast %260 : vector<1xf32> to vector<1x1xf32>
    %262 = arith.addf %261, %257 : vector<1x1xf32>
    %263 = tpu.iota {dimensions = array<i32: 1>} : vector<1x128xi32>
    %c0_i32_77 = arith.constant 0 : i32
    %264 = vector.broadcast %c0_i32_77 : i32 to vector<1x128xi32>
    %265 = arith.cmpi eq, %263, %264 : vector<1x128xi32>
    %cst_78 = arith.constant 0.000000e+00 : f32
    %266 = vector.shape_cast %200 : vector<1x1xf32> to vector<1x1xf32>
    %267 = vector.broadcast %266 : vector<1x1xf32> to vector<1x128xf32>
    %268 = vector.broadcast %cst_78 : f32 to vector<1x128xf32>
    %269 = arith.select %265, %267, %268 : vector<1x128xi1>, vector<1x128xf32>
    %c1_i32_79 = arith.constant 1 : i32
    %270 = vector.broadcast %c1_i32_79 : i32 to vector<1x128xi32>
    %271 = arith.cmpi eq, %263, %270 : vector<1x128xi32>
    %cst_80 = arith.constant 0.000000e+00 : f32
    %272 = vector.shape_cast %262 : vector<1x1xf32> to vector<1x1xf32>
    %273 = vector.broadcast %272 : vector<1x1xf32> to vector<1x128xf32>
    %274 = vector.broadcast %cst_80 : f32 to vector<1x128xf32>
    %275 = arith.select %271, %273, %274 : vector<1x128xi1>, vector<1x128xf32>
    %276 = arith.addf %269, %275 : vector<1x128xf32>
    %c2_i32 = arith.constant 2 : i32
    %277 = vector.broadcast %c2_i32 : i32 to vector<1x128xi32>
    %278 = arith.cmpi eq, %263, %277 : vector<1x128xi32>
    %cst_81 = arith.constant 0.000000e+00 : f32
    %279 = vector.shape_cast %225 : vector<1x1xf32> to vector<1x1xf32>
    %280 = vector.broadcast %279 : vector<1x1xf32> to vector<1x128xf32>
    %281 = vector.broadcast %cst_81 : f32 to vector<1x128xf32>
    %282 = arith.select %278, %280, %281 : vector<1x128xi1>, vector<1x128xf32>
    %283 = arith.addf %276, %282 : vector<1x128xf32>
    %c0_82 = arith.constant 0 : index
    %c0_83 = arith.constant 0 : index
    %c0_84 = arith.constant 0 : index
    %284 = vector.load %arg5[%c0_82, %c0_83, %c0_84] : memref<1x1x128xf32, #tpu.memory_space<vmem>>, vector<1x1x128xf32>
    %285 = vector.shape_cast %284 : vector<1x1x128xf32> to vector<1x128xf32>
    %286 = vector.shape_cast %283 : vector<1x128xf32> to vector<1x1x128xf32>
    tpu.vector_store %arg5[%c0_82, %c0_83, %c0_84], %286 {strides = array<i32>} : memref<1x1x128xf32, #tpu.memory_space<vmem>>, vector<1x1x128xf32>,
    return
  }
  func.func @transform_0(%arg0: i32) -> (i32, i32, i32) {
    %c0_i32 = arith.constant 0 : i32
    %c0_i32_0 = arith.constant 0 : i32
    %c0_i32_1 = arith.constant 0 : i32
    return %arg0, %c0_i32, %c0_i32_0 : i32, i32, i32
  }
  func.func @transform_1(%arg0: i32) -> (i32, i32, i32) {
    %c0_i32 = arith.constant 0 : i32
    %c0_i32_0 = arith.constant 0 : i32
    %c0_i32_1 = arith.constant 0 : i32
    return %arg0, %c0_i32, %c0_i32_0 : i32, i32, i32
  }
  func.func @transform_2(%arg0: i32) -> (i32, i32) {
    %c0_i32 = arith.constant 0 : i32
    %c0_i32_0 = arith.constant 0 : i32
    %c0_i32_1 = arith.constant 0 : i32
    return %c0_i32, %c0_i32_0 : i32, i32
  }
  func.func @transform_3(%arg0: i32) -> (i32, i32, i32) {
    %c0_i32 = arith.constant 0 : i32
    %c0_i32_0 = arith.constant 0 : i32
    %c0_i32_1 = arith.constant 0 : i32
    return %arg0, %c0_i32, %c0_i32_0 : i32, i32, i32
  }
  func.func @transform_4(%arg0: i32) -> (i32, i32, i32) {
    %c0_i32 = arith.constant 0 : i32
    %c0_i32_0 = arith.constant 0 : i32
    %c0_i32_1 = arith.constant 0 : i32
    return %arg0, %c0_i32, %c0_i32_0 : i32, i32, i32
  }
}

</mosaic_0001>

<bundles_post_ra>
// kernel: tpu_custom_call.1
= control target key start
LH: loop header
LB: loop body
LE: loop exit
PB: predicated region body
PF: predicated region fallthrough
CT: control target
= control target key end

     0   :  { %s1587_s0 = inlined_call_operand.hbm [shape: f32[2,4,128], index: 0, kind: input, shape index: {}]   ;;  %s1588_s1 = inlined_call_operand.hbm [shape: f32[2,8,128], index: 1, kind: input, shape index: {}]   ;;  %s1589_s2 = inlined_call_operand.hbm [shape: f32[4,128], index: 2, kind: input, shape index: {}]   ;;  %s1590_s3 = inlined_call_operand.hbm [shape: f32[2,4,5], index: 3, kind: input, shape index: {}]   ;;  %s1591_s4 = inlined_call_operand.hbm [shape: f32[2,1,128], index: 4, kind: output, shape index: {}]  }
   0x1   :  { %1597 = sst [smem:[#allocation19_spill]] %s1589_s2 }
   0x2   :  { %9 = vsyncpa [#allocation3], 0 }
   0x3   :  { %11 = vsyncpa [#allocation3 + $0x1], 0 }
   0x4   :  { %12 = vsyncpa [#allocation6], 0 }
   0x5   :  { %14 = vsyncpa [#allocation6 + $0x1], 0 }
   0x6   :  { %15 = vsyncpa [#allocation9], 0 }
   0x7   :  { %17 = vsyncpa [#allocation9 + $0x1], 0 }
   0x8   :  { %18 = vsyncpa [#allocation4], 0 }
   0x9   :  { %20 = vsyncpa [#allocation4 + $0x1], 0  ;;  %s1217_s15 = smov 0   ;;  %s1219_s16 = smov 0  }
   0xa   :  { %s1221_s17 = smov 0   ;;  %s1223_s18 = smov 0  }
   0xb LB: > { %1598 = sst [smem:[#allocation16_spill]] %s1163_s17  ;;  %s1238_s19 = sadd.s32 4294967295, %s1167_s18   ;;  %s1167_s18 = sphi %s1223_s18, %s1620_s18   ;;  %s1163_s17 = sphi %s1221_s17, %s1622_s17   ;;  %s1159_s16 = sphi %s1219_s16, %s1624_s16   ;;  %s1155_s15 = sphi %s1217_s15, %s1623_s15  }
   0xc   : > { %s812_s20 = sadd.s32 4294967294, %s1167_s18   ;;  %p46_p0 = scmp.ne.s32.totalorder %s1159_s16, %s1155_s15 }
   0xd   : > { %p47_p1 = scmp.eq.s32.totalorder %s1238_s19, 0  ;;  %p143_p2 = scmp.eq.s32.totalorder %s1238_s19, 1 }
   0xe   : > { %p149_p3 = scmp.eq.s32.totalorder %s812_s20, 1  ;;  %p813_p5 = scmp.ge.s32.totalorder %s1167_s18, 1 }
   0xf   : > { %p1247_p4 = por %p47_p1, %p46_p0  ;;  %p156_p7 = scmp.lt.s32.totalorder %s1167_s18, 3 }
  0x10   : > { %p1252_p6 = por %p149_p3, %p46_p0  ;;  %s1601_s2 = sld [smem:[#allocation19_spill]] }
  0x11   : > { %p1260_p8 = pnand %p813_p5, %p156_p7  ;;  %s1181_s27 = smov [#allocation7]  }
  0x12   : > { %s170_s28 = sshll.u32 %s1181_s27, 4  ;;  %s1270_s29 = sadd.s32 1, %s1167_s18   ;;  %s171_s28 = int_to_ptr.vmem [resolvable:$true] %s170_s28 }
  0x13   : > { %p846_p10 = pneg %p1260_p8  ;;  %1603 = sst [smem:[#allocation17_spill]] %s1270_s29 }
  0x14   : > { %s33_s30 = sadd.s32 1, %s1163_s17  ;;  %s30_s5 = ssub.s32 %s1167_s18, %s1270_s29 }
  0x15   : > { %p847_p11 = pnand %p846_p10, %p47_p1  ;;  %p31_p12 = scmp.eq.s32.totalorder %s30_s5, 0 }
  0x16   : > { %s168_s25 = sshll.u32 %s1601_s2, 4  ;;  %p40_p13 = scmp.ne.s32.totalorder %s1163_s17, %s1159_s16  ;;  %s169_s25 = int_to_ptr.hbm [resolvable:$true] %s168_s25 }
  0x17   : > { %849 = dma.hbm_to_vmem [thread:$0]  (!%p847_p11), %s169_s25, 64, %s171_s28, [#allocation6]  }
  0x18   : > { %p41_p0 = scmp.eq.s32.totalorder %s1167_s18, 0  ;;  %p865_p3 = scmp.lt.s32.totalorder %s1167_s18, 2 }
  0x19   : > { %s1280_s6 = scalar_select %p31_p12, %s1163_s17, %s33_s30  }
  0x1a   : > { %p42_p5 = por %p41_p0, %p40_p13  ;;  %p1284_p7 = por %p143_p2, %p40_p13 }
  0x1b   : > { %1604 = sst [smem:[#allocation18_spill]] %s1280_s6  ;;  %s1289_s8 = sand.u32 1, %s1163_s17  }
  0x1c   : > { %s1593_s9 = sshll.u32 %s1167_s18, 2  ;;  %s1592_s10 = sshll.u32 %s1289_s8, 2 }
  0x1d   : > { %s189_s13 = scalar_lea.hbm %s1587_s0, %s1593_s9  ;;  %s185_s20 = scalar_lea.vmem [#allocation2], %s1592_s10 }
  0x1e   : > { %s191_s14 = sshll.u32 %s189_s13, 4  ;;  %s193_s23 = sshll.u32 %s185_s20, 4  ;;  %s192_s14 = int_to_ptr.hbm [resolvable:$true] %s191_s14  ;;  %s194_s23 = int_to_ptr.vmem [resolvable:$true] %s193_s23 }
  0x1f   : > { %p1302_p2 = pnand %p865_p3, %p42_p5  ;;  %s200_s25 = sand.u32 1, %s1167_s18  }
  0x20   : > { %s818_s27 = sshll.u32 %s1289_s8, 3  ;;  %s182_s28 = scalar_lea.sflag [#allocation3], %s1289_s8 }
  0x21   : > { %s987_s30 = sshra.s32 %s192_s14, 4  ;;  %p991_p11 = pneg %p1302_p2  ;;  %s988_s30 = int_to_ptr.hbm [resolvable:$true] %s987_s30 }
  0x22   : > { %s989_s5 = scalar_lea.hbm %s988_s30, 4  ;;  %s994_s13 = scalar_lea.hbm %s1587_s0, 8 }
  0x23   : > { %p990_p10 = scmp.ne.s32.totalorder %s988_s30, %s989_s5  ;;  %p995_p0 = scmp.lt.s32.totalorder %s988_s30, %s1587_s0 }
  0x24   : > { %p996_p3 = scmp.lt.s32.totalorder %s994_s13, %s989_s5 }
  0x25   : > { %p992_p12 = pnand %p991_p11, %p990_p10 }
  0x26   : > { %p997_p5 = por %p996_p3, %p995_p0 }
  0x27   : > { %p993_p13 = pneg %p992_p12 }
  0x29   : > { %p998_p9 = pnand %p997_p5, %p993_p13 }
  0x2b   : > { %1001 = shalt.err (!%p998_p9)
}
  0x2c   : > { %853 = dma.hbm_to_vmem [thread:$0]  (!%p1302_p2), %s192_s14, 64, %s194_s23, %s182_s28  }
  0x2d   : > { %s819_s9 = sshll.u32 %s1167_s18, 3  ;;  %s204_s2 = scalar_lea.vmem [#allocation5], %s818_s27 }
  0x2e   : > { %s212_s6 = sshll.u32 %s204_s2, 4  ;;  %s208_s11 = scalar_lea.hbm %s1588_s1, %s819_s9  ;;  %s213_s6 = int_to_ptr.vmem [resolvable:$true] %s212_s6 }
  0x2f   : > { %s210_s12 = sshll.u32 %s208_s11, 4  ;;  %s201_s10 = scalar_lea.sflag [#allocation6], %s200_s25  ;;  %s211_s12 = int_to_ptr.hbm [resolvable:$true] %s210_s12 }
  0x30   : > { %s1017_s30 = sshra.s32 %s211_s12, 4  ;;  %s1024_s2 = scalar_lea.hbm %s1588_s1, 16  ;;  %s1018_s30 = int_to_ptr.hbm [resolvable:$true] %s1017_s30 }
  0x31   : > { %s1019_s5 = scalar_lea.hbm %s1018_s30, 8  ;;  %p1025_p13 = scmp.lt.s32.totalorder %s1018_s30, %s1588_s1 }
  0x32   : > { %p1020_p9 = scmp.ne.s32.totalorder %s1018_s30, %s1019_s5  ;;  %p1026_p0 = scmp.lt.s32.totalorder %s1024_s2, %s1019_s5 }
  0x34   : > { %p1022_p10 = pnand %p1020_p9, %p991_p11  ;;  %p1027_p3 = por %p1026_p0, %p1025_p13 }
  0x36   : > { %p1023_p12 = pneg %p1022_p10 }
  0x38   : > { %p1028_p5 = pnand %p1027_p3, %p1023_p12 }
  0x3a   : > { %1031 = shalt.err (!%p1028_p5)
}
  0x3b   : > { %856 = dma.hbm_to_vmem [thread:$0]  (!%p1302_p2), %s211_s12, 128, %s213_s6, %s201_s10  }
  0x3c   : > { %s1607_s17 = sshll.u32 %s1167_s18, 2  ;;  %s1608_s13 = sshll.u32 %s1289_s8, 2 }
  0x3d   : > { %s227_s25 = scalar_lea.hbm %s1590_s3, %s1607_s17  ;;  %s223_s20 = scalar_lea.vmem [#allocation8], %s1608_s13 }
  0x3e   : > { %s231_s11 = sshll.u32 %s223_s20, 4  ;;  %s229_s30 = sshll.u32 %s227_s25, 4  ;;  %s232_s11 = int_to_ptr.vmem [resolvable:$true] %s231_s11  ;;  %s230_s30 = int_to_ptr.hbm [resolvable:$true] %s229_s30 }
  0x3f   : > { %s220_s5 = scalar_lea.sflag [#allocation9], %s1289_s8  ;;  %s1047_s14 = sshra.s32 %s230_s30, 4  ;;  %s1048_s14 = int_to_ptr.hbm [resolvable:$true] %s1047_s14 }
  0x40   : > { %s1049_s23 = scalar_lea.hbm %s1048_s14, 4  ;;  %s1054_s10 = scalar_lea.hbm %s1590_s3, 8 }
  0x41   : > { %p1050_p9 = scmp.ne.s32.totalorder %s1048_s14, %s1049_s23  ;;  %p1055_p13 = scmp.lt.s32.totalorder %s1048_s14, %s1590_s3 }
  0x42   : > { %p1056_p0 = scmp.lt.s32.totalorder %s1054_s10, %s1049_s23 }
  0x43   : > { %p1052_p10 = pnand %p1050_p9, %p991_p11 }
  0x44   : > { %p1057_p3 = por %p1056_p0, %p1055_p13 }
  0x45   : > { %p1053_p12 = pneg %p1052_p10 }
  0x47   : > { %p1058_p5 = pnand %p1057_p3, %p1053_p12 }
  0x49   : > { %1061 = shalt.err (!%p1058_p5)
}
  0x4a   : > { %859 = dma.hbm_to_vmem [thread:$0]  (!%p1302_p2), %s230_s30, 64, %s232_s11, %s220_s5  }
  0x4b   : > { %240 = sbr.rel (%p1260_p8) target bundleno = 1142 (0x476), region = 36  ;;  %s1359_s8 = sand.u32 (!%p1260_p8), 1, %s1159_s16  }
  0x4c   : > { %s823_s28 = sshll.u32 (!%p1260_p8), %s1359_s8, 2  ;;  %s243_s17 = scalar_lea.sflag (!%p1260_p8), [#allocation3], %s1359_s8 }
  0x4d   : > { %s1363_s29 = scalar_lea.vmem (!%p1260_p8), [#allocation2], %s823_s28 }
  0x50   : > { %1134 = dma.done.wait (%p1247_p4), %s243_s17, 64  }
  0x51   : > { %1136 = vsyncadd (%p1247_p4), %s243_s17, 4294967232  ;;  %s252_s26 = sand.u32 1, %s1238_s19   ;;  %s824_s24 = sshll.u32 %s1359_s8, 3 }
  0x52   : > { %s253_s9 = scalar_lea.sflag [#allocation6], %s252_s26  ;;  %s1371_s25 = scalar_lea.vmem [#allocation5], %s824_s24 }
  0x53   : > { %1138 = dma.done.wait (%p1247_p4), %s253_s9, 128  }
  0x54   : > { %1140 = vsyncadd (%p1247_p4), %s253_s9, 4294967168 }
  0x55   : > { %1142 = dma.done.wait (%p47_p1), [#allocation6], 64  }
  0x56   : > { %1144 = vsyncadd (%p47_p1), [#allocation6], 4294967232  ;;  %s268_s13 = scalar_lea.sflag [#allocation9], %s1359_s8  ;;  %s271_s20 = scalar_lea.vmem [#allocation8], %s823_s28 }
  0x57   : > { %1146 = dma.done.wait (%p1247_p4), %s268_s13, 64  }
  0x58   : > { %1148 = vsyncadd (%p1247_p4), %s268_s13, 4294967232  ;;  %v1386_v0 = vld [vmem:[%s271_s20] sm:$0xf]  ;;  %s1182_s11 = smov 2   ;;  %v1183_v1 = vmov 2   ;;  %v1184_v2 = vmov 0   ;;  %v383_v51 = vlaneseq }
  0x59   : > { %346 = vrot.lane.b32.xlu0 %v1386_v0, %s1182_s11  ;;  %935 = vset.pattern.permute.xlu1 %v1183_v1  ;;  %s1185_s30 = smov 127   ;;  %v1186_v5 = vmov 3   ;;  %v1187_v6 = vmov 1   ;;  %v1394_v9 = vld [vmem:[#allocation7] sm:$0xf]  ;;  %vm389_vm4 = vcmask 1043456  }
  0x5a   : > { %939 = vset.pattern.permute.xlu0 %v1183_v1  ;;  %318 = vperm.xlu1 %935, %v1386_v0   ;;  %v310_v10 = vmul.f32 0.5, %v1394_v9  ;;  %v1188_v50 = vmov 4   ;;  %v1413_v52 = vand.u32 127, %v383_v51  ;;  %v1418_v61 = vld [vmem:[%s1371_s25] sm:$0xff]  ;;  %v387_v1 = vshrl.u32 %v383_v51, 7  ;;  %s305_s21 = scalar_lea.vmem [#allocation10], %s1359_s8 }
  0x5b   : > { %937 = vset.pattern.permute.xlu2 %v1186_v5  ;;  %v586_v62 = vrot.slane %v1418_v61, 4  ;;  %vm516_vm10 = vweird.f32 %v1394_v9  ;;  %s1177_s5 = smov 0  }
  0x5c   : > { %332 = vperm.xlu2 %937, %v1386_v0   ;;  %v312_v12 = vrot.slane %v310_v10, 2  ;;  %v385_v53 = vcvt.s32.f32 %v1413_v52  ;;  %v1424_v5 = vcvt.s32.f32 %v387_v1 }
  0x5e   : > { %v315_v14 = vadd.f32 %v312_v12, %v1394_v9  ;;  %v314_v15 = vsub.f32 %v1394_v9, %v312_v12 }
  0x60   : > { %v321_v16 = vperm.slane %v315_v14, 0  ;;  %v335_v17 = vperm.slane %v315_v14, 1  ;;  %v341_v18 = vperm.slane %v314_v15, 1  ;;  %v327_v19 = vperm.slane %v314_v15, 0 }
  0x61   : > { %v355_v20 = vsub.f32 %v315_v14, %v314_v15 }
  0x62   : > { %936 = vset.pattern.permute.xlu1 %v1184_v2 }
  0x63   : > { %324 = vperm.xlu1 %936, %v1386_v0   ;;  %v357_v27 = vrot.slane %v355_v20, 1 }
  0x64   : > { %938 = vset.pattern.permute.xlu2 %v1187_v6 }
  0x65   : > { %338 = vperm.xlu2 %938, %v1386_v0   ;;  %v359_v30 = vmul.f32 %v357_v27, %v355_v20  ;;  %v1189_v20 = vmov 0.0  }
  0x67   : > { %v365_v33 = vperm.slane %v359_v30, 0 }
  0xb6   : > { %v1397_v11 = vpop.permute.xlu2 %332 }
  0xb7   : > { %v336_v24 = vmin.f32 %v1397_v11, %v335_v17 }
  0xbf   : > { %v1403_v21 = vpop.permute.xlu2 %338 }
  0xc0   : > { %v342_v25 = vmax.f32 %v1403_v21, %v341_v18 }
  0xc2   : > { %v343_v28 = vsub.f32 %v336_v24, %v342_v25 }
  0xc4   : > { %v344_v31 = vmax.f32 %v343_v28, 0.0 }
  0xcb   : > { %v347_v3 = vpop.permute.xlu0 %346 }
  0xcc   : > { %v349_v4 = vsub.f32 %v1386_v0, %v347_v3  ;;  %v1399_v13 = vpop.permute.xlu1 %318 }
  0xcd   : > { %v322_v23 = vmin.f32 %v1399_v13, %v321_v16  ;;  %v487_v16 = vmul.f32 0.1, %v1394_v9 }
  0xce   : > { %351 = vrot.lane.b32.xlu0 %v349_v4, %s1185_s30 }
  0xd5   : > { %v1405_v22 = vpop.permute.xlu1 %324 }
  0xd6   : > { %v328_v26 = vmax.f32 %v1405_v22, %v327_v19  ;;  %v1435_v19 = vrot.slane %v487_v16, 2 }
  0xd8   : > { %v329_v29 = vsub.f32 %v322_v23, %v328_v26  ;;  %vm496_vm14 = vweird.f32 %v1435_v19 }
  0xda   : > { %v330_v32 = vmax.f32 %v329_v29, 0.0 }
  0xdc   : > { %v345_v35 = vmul.f32 %v344_v31, %v330_v32 }
 0x140   : > { %v352_v7 = vpop.permute.xlu0 %351 }
 0x141   : > { %v354_v8 = vmul.f32 %v352_v7, %v349_v4 }
 0x143   : > { %362 = vperm.xlu0 %939, %v354_v8  }
 0x14b   : > { %940 = vset.pattern.permute.xlu0 %v1188_v50 }
 0x14c   : > { %469 = vperm.xlu0 %940, %v1386_v0   ;;  %v587_v0 = vmax.f32 %v1418_v61, %v586_v62 }
 0x14e   : > { %v588_v2 = vrot.slane %v587_v0, 2 }
 0x150   : > { %v589_v4 = vmax.f32 %v587_v0, %v588_v2 }
 0x152   : > { %v590_v6 = vrot.slane %v589_v4, 1 }
 0x154   : > { %v1427_v7 = vmax.f32 %v589_v4, %v590_v6  ;;  %v520_v4 = vand.u32 2147483647, %v1394_v9 }
 0x156   : > { %v592_v12 = vsub.f32 %v1418_v61, %v1427_v7  ;;  %vm1487_vm13 = vcmp.eq.f32.partialorder %v520_v4, 8.507059e+37 }
 0x158   : > { %v593_v15 = vmul.f32 1.442695, %v592_v12 }
 0x1b5   : > { %v363_v34 = vpop.permute.xlu0 %362 }
 0x1b6   : > { %v366_v36 = vadd.f32 %v365_v33, %v363_v34 }
 0x1b8   : > { %v367_v37 = vsub.f32 %v366_v36, %v345_v35 }
 0x1ba   : > { %941 = vrcp.f32 %v367_v37  ;;  %v379_v41 = vand.u32 2147483648, %v367_v37  ;;  %v377_v43 = vand.u32 2147483647, %v367_v37  ;;  %vm373_vm1 = vweird.f32 %v367_v37 }
 0x1bb   : > { %943 = vrcp.f32 %v1394_v9 }
 0x1bc   : > { %v380_v45 = vor.u32 1.1754944e-38, %v379_v41  ;;  %vm378_vm3 = vcmp.eq.f32.partialorder %v377_v43, 8.507059e+37  ;;  %945 = vpow2.f32 %v593_v15 }
 0x1bd   : > { %947 = vrcp.f32 %v1435_v19 }
 0x1c0   : > { %v942_v38 = vpop.eup %941 }
 0x1c1   : > { %v369_v39 = vmul.f32 %v942_v38, %v367_v37  ;;  %vm374_vm0 = vweird.f32 %v942_v38  ;;  %v1441_v30 = vpop.eup %943 }
 0x1c2   : > { %vm375_vm2 = vmor %vm373_vm1, %vm374_vm0  ;;  %v946_v31 = vpop.eup %945  ;;  %vm517_vm11 = vweird.f32 %v1441_v30 }
 0x1c3   : > { %v370_v40 = vsub.f32 1.0, %v369_v39  ;;  %v595_v37 = vrot.slane %v946_v31, 4  ;;  %v1446_v41 = vpop.eup %947  ;;  %vm1474_vm12 = vmor %vm516_vm10, %vm517_vm11  ;;  %vm582_vm10 = vcmask 1040384  }
 0x1c4   : > { %vm497_vm15 = vweird.f32 %v1446_v41 }
 0x1c5   : > { %v371_v42 = vmul.f32 %v942_v38, %v370_v40  ;;  %vm1498_vm0 = vmor %vm496_vm14, %vm497_vm15 }
 0x1c7   : > { %v372_v44 = vadd.f32 %v942_v38, %v371_v42 }
 0x1c9   : > { %v376_v46 = vsel %vm375_vm2, %v942_v38, %v372_v44  ;;  %v512_v38 = vmul.f32 %v1441_v30, %v1394_v9 }
 0x1ca   : > { %v381_v47 = vsel %vm378_vm3, %v380_v45, %v376_v46  ;;  %v596_v45 = vadd.f32 %v946_v31, %v595_v37 }
 0x1cb   : > { %v382_v48 = vmul.f32 %v381_v47, %v345_v35  ;;  %v513_v46 = vsub.f32 1.0, %v512_v38 }
 0x1cd   : > { %v390_v49 = vsel %vm389_vm4, %v382_v48, -inf }
 0x1ce   : > { %391 = vmax.xlane.f32.xlu1 %v390_v49  ;;  %v398_v57 = vrot.slane %v390_v49, 4 }
 0x1d0   : > { %v399_v58 = vmax.f32 %v390_v49, %v398_v57  ;;  %v492_v49 = vmul.f32 %v1446_v41, %v1435_v19 }
 0x1d2   : > { %v400_v59 = vrot.slane %v399_v58, 2 }
 0x1d4   : > { %v401_v60 = vmax.f32 %v399_v58, %v400_v59  ;;  %v1190_v58 = vmov 0.2  }
 0x1d5   : > { %949 = vrcp.f32 %v1190_v58 }
 0x1d6   : > { %v402_v63 = vrot.slane %v401_v60, 1 }
 0x1d8   : > { %v1422_v3 = vmax.f32 %v401_v60, %v402_v63 }
 0x1da   : > { %vm404_vm6 = vcmp.eq.f32.partialorder %v382_v48, %v1422_v3 }
 0x1db   : > { %v405_v8 = vsel %vm404_vm6, %v1424_v5, 4.0 }
 0x1dc   : > { %v406_v10 = vsel %vm389_vm4, %v405_v8, inf }
 0x1dd   : > { %v407_v14 = vrot.slane %v406_v10, 4 }
 0x1df   : > { %v408_v17 = vmin.f32 %v406_v10, %v407_v14 }
 0x1e1   : > { %v409_v25 = vrot.slane %v408_v17, 2 }
 0x1e3   : > { %v410_v34 = vmin.f32 %v408_v17, %v409_v25  ;;  %v502_v17 = vand.u32 2147483648, %v1435_v19 }
 0x1e5   : > { %v411_v42 = vrot.slane %v410_v34, 1 }
 0x1e7   : > { %v412_v50 = vmin.f32 %v410_v34, %v411_v42 }
 0x241   : > { %v392_v54 = vpop.xlane.xlu1 %391 }
 0x242   : > { %vm393_vm5 = vcmp.eq.f32.partialorder %v382_v48, %v392_v54  ;;  %v514_v54 = vmul.f32 %v1441_v30, %v513_v46 }
 0x243   : > { %v394_v55 = vsel %vm393_vm5, %v385_v53, 128.0 }
 0x244   : > { %v395_v56 = vsel %vm389_vm4, %v394_v55, inf  ;;  %v470_v55 = vpop.permute.xlu0 %469  ;;  %v515_v2 = vadd.f32 %v1441_v30, %v514_v54 }
 0x245   : > { %396 = vmin.xlane.f32.xlu2 %v395_v56  ;;  %v493_v56 = vsub.f32 1.0, %v492_v49 }
 0x246   : > { %v519_v31 = vsel %vm1474_vm12, %v1441_v30, %v515_v2 }
 0x247   : > { %v494_v16 = vmul.f32 %v1446_v41, %v493_v56  ;;  %v503_v56 = vor.u32 1.1754944e-38, %v502_v17 }
 0x2b8   : > { %v397_v18 = vpop.xlane.xlu2 %396 }
 0x2b9   : > { %vm413_vm7 = vcmp.eq.f32.partialorder %v397_v18, %v385_v53  ;;  %v597_v53 = vrot.slane %v596_v45, 2  ;;  %v522_v18 = vand.u32 2147483648, %v1394_v9 }
 0x2ba   : > { %v414_v23 = vsel %vm413_vm7, 1.0, %v1189_v20  ;;  %v423_v24 = vsel %vm413_vm7, %v1424_v5, -1.0 }
 0x2bb   : > { %v415_v26 = vsel %vm389_vm4, %v414_v23, -inf  ;;  %v424_v27 = vsel %vm389_vm4, %v423_v24, -inf  ;;  %v598_v1 = vadd.f32 %v597_v53, %v596_v45  ;;  %v1482_v23 = vpop.eup %949  ;;  %v500_v45 = vand.u32 2147483647, %v1435_v19 }
 0x2bc   : > { %v416_v28 = vrot.slane %v415_v26, 4  ;;  %v425_v29 = vrot.slane %v424_v27, 4  ;;  %v529_v38 = vmul.f32 0.2, %v1482_v23  ;;  %v523_v46 = vor.u32 1.1754944e-38, %v522_v18 }
 0x2bd   : > { %vm501_vm1 = vcmp.eq.f32.partialorder %v500_v45, 8.507059e+37  ;;  %vm533_vm5 = vweird.f32 %v1482_v23 }
 0x2be   : > { %v417_v32 = vmax.f32 %v415_v26, %v416_v28  ;;  %v426_v33 = vmax.f32 %v424_v27, %v425_v29  ;;  %v599_v29 = vrot.slane %v598_v1, 1  ;;  %v524_v19 = vsel %vm1487_vm13, %v523_v46, %v519_v31 }
 0x2c0   : > { %v418_v35 = vrot.slane %v417_v32, 2  ;;  %v427_v36 = vrot.slane %v426_v33, 2 }
 0x2c2   : > { %v419_v39 = vmax.f32 %v417_v32, %v418_v35  ;;  %v428_v40 = vmax.f32 %v426_v33, %v427_v36 }
 0x2c4   : > { %v420_v43 = vrot.slane %v419_v39, 1  ;;  %v429_v44 = vrot.slane %v428_v40, 1 }
 0x2c6   : > { %v1448_v47 = vmax.f32 %v419_v39, %v420_v43  ;;  %v430_v48 = vmax.f32 %v428_v40, %v429_v44  ;;  %v495_v44 = vadd.f32 %v1446_v41, %v494_v16 }
 0x2c8   : > { %vm422_vm8 = vcmp.gt.f32.partialorder %v1448_v47, 0.5  ;;  %v306_v47 = vld [vmem:[%s1363_s29] sm:$0xf] }
 0x2c9   : > { %v431_v51 = vsel %vm422_vm8, %v430_v48, %v412_v50 }
 0x2ca   : > { %vm433_vm9 = vcmp.eq.f32.partialorder %v1424_v5, %v431_v51 }
 0x2cb   : > { %v827_v57 = vsel %vm433_vm9, 1.0, %v1189_v20 }
 0x2cc   : > { %v436_v59 = vmul.f32 %v827_v57, %v1405_v22  ;;  %v444_v60 = vmul.f32 %v827_v57, %v1403_v21  ;;  %v452_v62 = vmul.f32 %v827_v57, %v1399_v13  ;;  %v460_v63 = vmul.f32 %v827_v57, %v1397_v11 }
 0x2cd   : > { %v472_v0 = vmul.f32 %v827_v57, %v470_v55  ;;  %v600_v55 = vadd.f32 %v599_v29, %v598_v1  ;;  %v530_v57 = vsub.f32 1.0, %v529_v38  ;;  %v432_v1 = vsel %vm422_vm8, 2.0, %v1422_v3 }
 0x2ce   : > { %v437_v6 = vsel %vm389_vm4, %v436_v59, 0.0  ;;  %v445_v8 = vsel %vm389_vm4, %v444_v60, 0.0  ;;  %v453_v10 = vsel %vm389_vm4, %v452_v62, 0.0  ;;  %v461_v22 = vsel %vm389_vm4, %v460_v63, 0.0 }
 0x2cf   : > { %v438_v12 = vrot.slane %v437_v6, 4  ;;  %v446_v21 = vrot.slane %v445_v8, 4  ;;  %v454_v14 = vrot.slane %v453_v10, 4  ;;  %v462_v13 = vrot.slane %v461_v22, 4 }
 0x2d0   : > { %v473_v15 = vsel %vm389_vm4, %v472_v0, 0.0  ;;  %v499_v0 = vsel %vm1498_vm0, %v1446_v41, %v495_v44  ;;  %951 = vlog2.f32 %v600_v55  ;;  %vm480_vm2 = vcmp.lt.f32.partialorder %v432_v1, 0.5 }
 0x2d1   : > { %v439_v24 = vadd.f32 %v438_v12, %v437_v6  ;;  %v447_v25 = vadd.f32 %v446_v21, %v445_v8  ;;  %v455_v26 = vadd.f32 %v454_v14, %v453_v10  ;;  %v463_v27 = vadd.f32 %v462_v13, %v461_v22 }
 0x2d2   : > { %v474_v28 = vrot.slane %v473_v15, 4  ;;  %v531_v22 = vmul.f32 %v1482_v23, %v530_v57  ;;  %v504_v11 = vsel %vm501_vm1, %v503_v56, %v499_v0 }
 0x2d3   : > { %v440_v33 = vrot.slane %v439_v24, 2  ;;  %v448_v34 = vrot.slane %v447_v25, 2  ;;  %v456_v35 = vrot.slane %v455_v26, 2  ;;  %v464_v36 = vrot.slane %v463_v27, 2 }
 0x2d4   : > { %v475_v37 = vadd.f32 %v474_v28, %v473_v15  ;;  %v532_v3 = vadd.f32 %v1482_v23, %v531_v22 }
 0x2d5   : > { %v441_v39 = vadd.f32 %v440_v33, %v439_v24  ;;  %v449_v40 = vadd.f32 %v448_v34, %v447_v25  ;;  %v457_v42 = vadd.f32 %v456_v35, %v455_v26  ;;  %v465_v43 = vadd.f32 %v464_v36, %v463_v27 }
 0x2d6   : > { %v476_v30 = vrot.slane %v475_v37, 2  ;;  %v952_v25 = vpop.eup %951  ;;  %v534_v33 = vsel %vm533_vm5, %v1482_v23, %v532_v3 }
 0x2d7   : > { %v442_v48 = vrot.slane %v441_v39, 1  ;;  %v450_v49 = vrot.slane %v449_v40, 1  ;;  %v458_v50 = vrot.slane %v457_v42, 1  ;;  %v466_v51 = vrot.slane %v465_v43, 1 }
 0x2d8   : > { %v477_v54 = vadd.f32 %v476_v30, %v475_v37  ;;  %v602_v35 = vmul.f32 0.6931472, %v952_v25 }
 0x2d9   : > { %v443_v58 = vadd.f32 %v442_v48, %v441_v39  ;;  %v451_v59 = vadd.f32 %v450_v49, %v449_v40  ;;  %v459_v60 = vadd.f32 %v458_v50, %v457_v42  ;;  %v467_v62 = vadd.f32 %v466_v51, %v465_v43 }
 0x2da   : > { %v478_v63 = vrot.slane %v477_v54, 1  ;;  %v603_v23 = vadd.f32 %v602_v35, %v1427_v7 }
 0x2db   : > { %v484_v2 = vadd.f32 %v459_v60, %v443_v58  ;;  %v506_v4 = vadd.f32 %v467_v62, %v451_v59  ;;  %v510_v6 = vsub.f32 %v459_v60, %v443_v58  ;;  %v536_v8 = vsub.f32 %v467_v62, %v451_v59 }
 0x2dc   : > { %v479_v10 = vadd.f32 %v478_v63, %v477_v54 }
 0x2dd   : > { %v485_v12 = vmul.f32 0.5, %v484_v2  ;;  %v507_v21 = vmul.f32 0.5, %v506_v4  ;;  %v525_v41 = vmul.f32 %v524_v19, %v510_v6  ;;  %v537_v14 = vmul.f32 %v536_v8, %v524_v19 }
 0x2de   : > { %v481_v13 = vadd.f32 1.0, %v479_v10 }
 0x2df   : > { %v486_v15 = vsub.f32 %v485_v12, %v1394_v9  ;;  %v508_v16 = vsub.f32 %v507_v21, %v1394_v9  ;;  %953 = vlog2.f32 %v525_v41 }
 0x2e0   : > { %v1513_v17 = vsel %vm480_vm2, 0.0, %v481_v13  ;;  %955 = vlog2.f32 %v537_v14 }
 0x2e1   : > { %vm483_vm3 = vcmp.gt.f32.partialorder %v1513_v17, 0.5  ;;  %vm604_vm4 = vcmp.eq.f32.partialorder %v1424_v5, %v1513_v17  ;;  %v505_v18 = vmul.f32 %v504_v11, %v486_v15  ;;  %v509_v24 = vmul.f32 %v508_v16, %v504_v11 }
 0x2e2   : > { %v614_v26 = vsel %vm483_vm3, 1.0, %v1189_v20  ;;  %v605_v9 = vsel %vm604_vm4, %v1418_v61, 0.0 }
 0x2e3   : > { %615 = vadd.xlane.f32.xlu0 %v614_v26  ;;  %v606_v27 = vrot.slane %v605_v9, 4  ;;  %v541_v28 = vsub.f32 %v306_v47, %v505_v18  ;;  %v548_v29 = vsub.f32 %v306_v47, %v509_v24  ;;  %v1173_v24 = vmov 4294967295  }
 0x2e5   : > { %v954_v31 = vpop.eup %953  ;;  %v607_v32 = vadd.f32 %v606_v27, %v605_v9  ;;  %v549_v5 = vand.u32 2147483647, %v548_v29  ;;  %v551_v37 = vmul.f32 0.5, %v548_v29  ;;  %v542_v40 = vand.u32 2147483647, %v541_v28 }
 0x2e6   : > { %v956_v34 = vpop.eup %955  ;;  %v527_v36 = vmul.f32 0.6931472, %v954_v31  ;;  %v544_v61 = vmul.f32 0.5, %v541_v28 }
 0x2e7   : > { %v608_v38 = vrot.slane %v607_v32, 2  ;;  %v539_v39 = vmul.f32 0.6931472, %v956_v34  ;;  %vm1526_vm6 = vcmp.lt.f32.partialorder %v549_v5, 1.0  ;;  %v552_v30 = vmul.f32 %v551_v37, %v548_v29 }
 0x2e8   : > { %v535_v42 = vmul.f32 %v534_v33, %v527_v36  ;;  %v829_v46 = vadd.f32 -0.5, %v549_v5  ;;  %vm1531_vm7 = vcmp.lt.f32.partialorder %v542_v40, 1.0  ;;  %v545_v54 = vmul.f32 %v544_v61, %v541_v28 }
 0x2e9   : > { %v609_v44 = vadd.f32 %v608_v38, %v607_v32  ;;  %v540_v45 = vmul.f32 %v539_v39, %v534_v33  ;;  %v828_v55 = vadd.f32 -0.5, %v542_v40 }
 0x2ea   : > { %v559_v48 = vsub.f32 %v306_v47, %v535_v42  ;;  %v554_v51 = vsel %vm1526_vm6, %v552_v30, %v829_v46 }
 0x2eb   : > { %v610_v49 = vrot.slane %v609_v44, 1  ;;  %v570_v53 = vsub.f32 %v306_v47, %v540_v45  ;;  %v556_v59 = vrot.slane %v554_v51, 1  ;;  %v547_v4 = vsel %vm1531_vm7, %v545_v54, %v828_v55 }
 0x2ec   : > { %v560_v56 = vand.u32 2147483647, %v559_v48  ;;  %v562_v57 = vmul.f32 0.5, %v559_v48 }
 0x2ed   : > { %v611_v58 = vadd.f32 %v610_v49, %v609_v44  ;;  %v571_v60 = vand.u32 2147483647, %v570_v53  ;;  %v573_v62 = vmul.f32 0.5, %v570_v53  ;;  %v558_v1 = vadd.f32 %v556_v59, %v547_v4 }
 0x2ee   : > { %vm561_vm8 = vcmp.lt.f32.partialorder %v560_v56, 1.0  ;;  %v563_v7 = vmul.f32 %v562_v57, %v559_v48  ;;  %v830_v63 = vadd.f32 -0.5, %v560_v56 }
 0x2ef   : > { %v612_v0 = vsub.f32 %v603_v23, %v611_v58  ;;  %vm572_vm9 = vcmp.lt.f32.partialorder %v571_v60, 1.0  ;;  %v574_v19 = vmul.f32 %v573_v62, %v570_v53  ;;  %v831_v2 = vadd.f32 -0.5, %v571_v60 }
 0x2f0   : > { %v565_v6 = vsel %vm561_vm8, %v563_v7, %v830_v63 }
 0x2f1   : > { %v613_v8 = vsel %vm483_vm3, 0.0, %v612_v0  ;;  %v567_v10 = vrot.slane %v565_v6, 2  ;;  %v576_v22 = vsel %vm572_vm9, %v574_v19, %v831_v2 }
 0x2f2   : > { %620 = vmax.xlane.f32.xlu1 %v613_v8  ;;  %v578_v21 = vrot.slane %v576_v22, 3 }
 0x2f3   : > { %v569_v12 = vadd.f32 %v567_v10, %v558_v1 }
 0x2f5   : > { %v580_v41 = vadd.f32 %v578_v21, %v569_v12 }
 0x2f7   : > { %v581_v14 = vsel %vm483_vm3, %v580_v41, 0.0 }
 0x2f8   : > { %v583_v13 = vsel %vm582_vm10, %v581_v14, 0.0 }
 0x2f9   : > { %584 = vadd.xlane.f32.xlu2 %v583_v13 }
 0x356   : > { %v616_v11 = vpop.xlane.xlu0 %615 }
 0x357   : > { %v617_v15 = vmul.f32 3.0, %v616_v11 }
 0x359   : > { %v618_v16 = vmin.f32 %v617_v15, 127.0 }
 0x365   : > { %v621_v47 = vpop.xlane.xlu1 %620  }
 0x366   : > { %v1169_v18 = vmov %v621_v47  }
 0x36c   : > { %v585_v3 = vpop.xlane.xlu2 %584 }
 0x36d LB: >> { %v631_v25 = vsub.s32 %v1171_v18, %v1175_v24  ;;  %v1191_v27 = vmov 0.0   ;;  %s628_s5 = sadd.s32 1, %s1179_s5   ;;  %s1179_s5 = sphi %s1177_s5, %s628_s5   ;;  %v1175_v24 = vphi %v1173_v24, %v639_v24   ;;  %v1171_v18 = vphi %v1169_v18, %v1170_v18  }
 0x36e   : >> { %p625_p1 = scmp.ge.s32.totalorder %s628_s5, 32  }
 0x36f   : >> { %v632_v26 = vshra.s32 %v631_v25, 1  ;;  %v654_v32 = vsel (%p625_p1), %vm483_vm3, %v612_v0, 0.0  ;;  %vm652_vm14 = vcmp.ge.f32.partialorder (%p625_p1), %v618_v16, 1.0  ;;  %vm658_vm15 = vcmp.eq.s32.totalorder (%p625_p1), %v1413_v52, 0  ;;  %s676_s6 = scalar_lea.hbm (%p625_p1), %s1591_s4, %s1238_s19  ;;  %s678_s12 = sshll.u32 (%p625_p1), %s305_s21, 4  ;;  %s679_s12 = int_to_ptr.vmem [resolvable:$true] %s678_s12 }
 0x370   : > { %655 = vadd.xlane.f32.xlu1 (%p625_p1), %v654_v32  ;;  %vm660_vm0 = vcmp.eq.s32.totalorder (%p625_p1), %v1413_v52, 1  ;;  %vm663_vm1 = vcmp.eq.s32.totalorder (%p625_p1), %v1413_v52, 2  ;;  %v659_v17 = vsel (%p625_p1), %vm658_vm15, %v585_v3, 0.0  ;;  %s680_s10 = sshll.u32 (%p625_p1), %s676_s6, 4  ;;  %s668_s2 = scalar_lea.sflag (%p625_p1), [#allocation4], %s1359_s8  ;;  %s681_s10 = int_to_ptr.hbm [resolvable:$true] %s680_s10 }
 0x371   : >> { %v633_v9 = vadd.s32 %v1175_v24, %v632_v26  ;;  %v664_v61 = vsel (%p625_p1), %vm663_vm1, %v616_v11, 0.0  ;;  %s1091_s27 = sshra.s32 (%p625_p1), %s681_s10, 4  ;;  %s1097_s29 = scalar_lea.hbm (%p625_p1), %s1591_s4, 2  ;;  %s1092_s27 = int_to_ptr.hbm [resolvable:$true] %s1091_s27 }
 0x372   : > { %s1093_s28 = scalar_lea.hbm (%p625_p1), %s1092_s27, 1  ;;  %p1098_p11 = scmp.lt.s32.totalorder (%p625_p1), %s1092_s27, %s1591_s4 }
 0x373   : >> { %vm634_vm11 = vcmp.gt.s32.totalorder %v613_v8, %v633_v9  ;;  %p1094_p4 = scmp.ne.s32.totalorder (%p625_p1), %s1092_s27, %s1093_s28  ;;  %p1099_p9 = scmp.lt.s32.totalorder (%p625_p1), %s1097_s29, %s1093_s28 }
 0x374   : >> { %v635_v28 = vsel %vm634_vm11, 1.0, %v1191_v27 }
 0x375   : >> { %636 = vadd.xlane.f32.xlu0 %v635_v28  ;;  %p1095_p8 = pnand (%p625_p1), %p1094_p4, %p1284_p7  ;;  %p1100_p10 = por (%p625_p1), %p1099_p9, %p1098_p11 }
 0x377   : > { %p1096_p2 = pneg (%p625_p1), %p1095_p8 }
 0x379   : > { %p1101_p12 = pnand (%p625_p1), %p1100_p10, %p1096_p2 }
 0x3e3   : > { %v656_v39 = vpop.xlane.xlu1 (%p625_p1), %655 }
 0x3e7   : > { %627 = sbr.rel (!%p625_p1) target bundleno = 877 (0x36d), region = 118 }
 0x3e8   : >> { %v637_v29 = vpop.xlane.xlu0 %636 }
 0x3e9   : >> { %vm638_vm12 = vcmp.lt.f32.partialorder %v637_v29, %v618_v16 }
 0x3ea   : >> { %v639_v24 = vsel %vm638_vm12, %v1175_v24, %v633_v9   ;;  %v640_v31 = vsel %vm638_vm12, %v633_v9, %v1171_v18  }
 0x3eb   : >> { %v1170_v18 = vmov %v640_v31   ;;  %vm642_vm13 = vcmp.gt.s32.totalorder (%p625_p1), %v613_v8, %v640_v31 }
 0x3ec   : > { %v643_v33 = vsel %vm642_vm13, 1.0, %v1189_v20  ;;  %v646_v5 = vsel %vm642_vm13, %v613_v8, 0.0 }
 0x3ed   : > { %644 = vadd.xlane.f32.xlu0 %v643_v33 }
 0x3f5   : > { %647 = vadd.xlane.f32.xlu0 %v646_v5 }
 0x460   : > { %v645_v34 = vpop.xlane.xlu0 %644 }
 0x461   : > { %v649_v35 = vsub.f32 %v618_v16, %v645_v34 }
 0x463   : > { %v650_v36 = vmul.f32 %v649_v35, %v640_v31 }
 0x468   : > { %v648_v37 = vpop.xlane.xlu0 %647 }
 0x469   : > { %v651_v38 = vadd.f32 %v650_v36, %v648_v37 }
 0x46b   : > { %v653_v20 = vsel %vm652_vm14, %v651_v38, 0.0 }
 0x46c   : > { %v657_v40 = vadd.f32 %v656_v39, %v653_v20 }
 0x46e   : > { %v661_v42 = vsel %vm660_vm0, %v657_v40, 0.0 }
 0x46f   : > { %v662_v43 = vadd.f32 %v661_v42, %v659_v17 }
 0x471   : > { %v665_v30 = vadd.f32 %v664_v61, %v662_v43 }
 0x473   : > { %666 = vst [vmem:[%s305_s21] sm:$0x1] %v665_v30 }
 0x474   : > { %1104 = shalt.err (!%p1101_p12)
}
 0x475   : > { %844 = dma.vmem_to_hbm [thread:$0]  (%p1284_p7), %s679_s12, 16, %s681_s10, %s668_s2  }
 0x476 PF: > { %s692_s8 = sand.u32 1, %s1155_s15   ;;  %p1619_p13 = scmp.ge.s32.totalorder %s1167_s18, 2 }
 0x477   : > { %s693_s9 = scalar_lea.sflag [#allocation4], %s692_s8 }
 0x478   : > { %p861_p0 = pnand %p1619_p13, %p1252_p6 }
 0x47a   : > { %p862_p3 = pneg %p861_p0 }
 0x47c   : > { %1150 = dma.done.wait (%p862_p3), %s693_s9, 16  }
 0x47d   : > { %1152 = vsyncadd (%p862_p3), %s693_s9, 4294967280  ;;  %s1620_s18 = sld [smem:[#allocation17_spill]]  ;;  %s1623_s15 = smov %s1159_s16 }
 0x47e   : > { %s1621_s25 = sld [smem:[#allocation16_spill]] }
 0x47f   : > { %s1622_s17 = sld [smem:[#allocation18_spill]] }
 0x483   : > { %p23_p5 = scmp.ge.s32.totalorder %s1620_s18, 4  }
 0x484   : > { %s1624_s16 = smov %s1621_s25 }
 0x485   :  { %25 = sbr.rel (!%p23_p5) target bundleno = 11 (0xb), region = 129 }
 0x48a   :  { %698 = vsyncpa [#allocation3], 1 }
 0x48b   :  { %700 = vsyncpa [#allocation3 + $0x1], 1 }
 0x48c   :  { %701 = vsyncpa [#allocation6], 1 }
 0x48d   :  { %703 = vsyncpa [#allocation6 + $0x1], 1 }
 0x48e   :  { %704 = vsyncpa [#allocation9], 1 }
 0x48f   :  { %706 = vsyncpa [#allocation9 + $0x1], 1 }
 0x490   :  { %707 = vsyncpa [#allocation4], 1 }
 0x491   :  { %709 = vsyncpa [#allocation4 + $0x1], 1 }

</bundles_post_ra>
